<compile_context>
chip_gen: v7x
topology: tpu7x:2x2x1
jax: 0.10.0
libtpu: 0.0.40
codegen_flags: <defaults>
</compile_context>

<pallas_src>
import functools

import jax
import jax.numpy as jnp
from jax.experimental import pallas as pl
from jax.experimental.pallas import tpu as pltpu

LANE = 128      # TPU lane width: feature dims are padded to a multiple of this
TILE_B = 512    # default replay-buffer batch tile (rows per grid step)


def _round_up(n, m):
    return ((n + m - 1) // m) * m


def _pick_tile_b(batch, target=TILE_B):
    """Choose batch-tile rows.

    - Tiny batches (acting / epsilon-greedy path, B <= 8): tile == B, so a
      single-state inference stays at the launch-overhead floor.
    - Large batches: use big tiles (amortize ~0.35 us/step grid overhead) but
      keep >= 2 tiles so the "parallel" axis can shard across v7x's 2 TCs.
    """
    if batch <= 8:
        return batch                               # block == full batch dim
    tile = min(target, _round_up(batch, 8))
    if pl.cdiv(batch, tile) < 2:                   # keep >= 2 tiles (v7x megacore)
        tile = max(8, _round_up(pl.cdiv(batch, 2), 8))
    return tile


# ----------------------------------------------------------------------------
# Kernels
# ----------------------------------------------------------------------------
def qnetwork_kernel(x_ref, w1_ref, b1_ref, w2_ref, b2_ref, w3_ref, b3_ref, o_ref):
    """Fused 3-layer MLP on one batch tile; writes full (padded) Q-values."""
    x = x_ref[...]
    h1 = jnp.dot(x, w1_ref[...], preferred_element_type=jnp.float32) + b1_ref[...]
    h1 = jnp.maximum(h1, 0.0)
    h2 = jnp.dot(h1, w2_ref[...], preferred_element_type=jnp.float32) + b2_ref[...]
    h2 = jnp.maximum(h2, 0.0)
    o_ref[...] = jnp.dot(h2, w3_ref[...], preferred_element_type=jnp.float32) + b3_ref[...]


def qnetwork_max_kernel(x_ref, w1_ref, b1_ref, w2_ref, b2_ref, w3_ref, b3_ref,
                        o_ref, *, action_size):
    """Same MLP with a fused epilogue: max over real actions -> [tile_b, 1].

    Used for the DQN target path (max_a Q_target(s', a)); writes ~128x fewer
    output bytes than the padded full-Q path.
    """
    x = x_ref[...]
    h1 = jnp.dot(x, w1_ref[...], preferred_element_type=jnp.float32) + b1_ref[...]
    h1 = jnp.maximum(h1, 0.0)
    h2 = jnp.dot(h1, w2_ref[...], preferred_element_type=jnp.float32) + b2_ref[...]
    h2 = jnp.maximum(h2, 0.0)
    q = jnp.dot(h2, w3_ref[...], preferred_element_type=jnp.float32) + b3_ref[...]
    lane = jax.lax.broadcasted_iota(jnp.int32, q.shape, dimension=1)
    q = jnp.where(lane < action_size, q, -jnp.inf)   # mask padded action lanes
    o_ref[...] = jnp.max(q, axis=-1, keepdims=True)


# ----------------------------------------------------------------------------
# pallas_call wrapper
# ----------------------------------------------------------------------------
def _run_mlp(kernel, x, p, out_width, tile_b):
    B, S = x.shape
    w1, b1, w2, b2, w3, b3 = p["w1"], p["b1"], p["w2"], p["b2"], p["w3"], p["b3"]

    # Weights/biases: constant block index -> fetched once, VMEM-resident.
    resident = lambda shape: pl.BlockSpec(shape, lambda i: (0, 0))

    # Advisory cost estimate (tiny, mem-bound custom call).
    param_bytes = sum(int(a.size) * a.dtype.itemsize for a in (w1, b1, w2, b2, w3, b3))
    bytes_accessed = int(x.size) * x.dtype.itemsize + param_bytes + B * out_width * 4
    flops = 2 * B * (w1.shape[0] * w1.shape[1]
                     + w2.shape[0] * w2.shape[1]
                     + w3.shape[0] * w3.shape[1])

    return pl.pallas_call(
        kernel,
        out_shape=jax.ShapeDtypeStruct((B, out_width), jnp.float32),
        grid=(pl.cdiv(B, tile_b),),          # ragged last block handled by Pallas
        in_specs=[
            pl.BlockSpec((tile_b, S), lambda i: (i, 0)),   # activations stream
            resident(w1.shape), resident(b1.shape),
            resident(w2.shape), resident(b2.shape),
            resident(w3.shape), resident(b3.shape),
        ],
        out_specs=pl.BlockSpec((tile_b, out_width), lambda i: (i, 0)),
        compiler_params=pltpu.CompilerParams(
            dimension_semantics=("parallel",),   # batch tiles -> both TCs on v7x
        ),
        cost_estimate=pl.CostEstimate(
            flops=int(flops), transcendentals=0, bytes_accessed=int(bytes_accessed)),
    )(x, w1, b1, w2, b2, w3, b3)


def qnetwork_forward(x, padded_params, action_size, tile_b=None):
    """Full Q-values [B, action_size] (training / action-gather path)."""
    tile_b = _pick_tile_b(x.shape[0]) if tile_b is None else tile_b
    out_width = padded_params["w3"].shape[1]     # lane-dense padded width
    out = _run_mlp(qnetwork_kernel, x, padded_params, out_width, tile_b)
    return out[:, :action_size]


def qnetwork_max(x, padded_params, action_size, tile_b=None):
    """Fused max_a Q(s, a) -> [B, 1] (DQN target / greedy-value path)."""
    tile_b = _pick_tile_b(x.shape[0]) if tile_b is None else tile_b
    kernel = functools.partial(qnetwork_max_kernel, action_size=action_size)
    return _run_mlp(kernel, x, padded_params, 1, tile_b)


# ----------------------------------------------------------------------------
# Params
# ----------------------------------------------------------------------------
def init_qnetwork_params(key, state_size, action_size, first_hid, second_hid):
    """PyTorch nn.Linear-style init (uniform +/- 1/sqrt(fan_in)).

    Weights stored pre-transposed as [in, out]; biases as [1, out]."""
    ks = jax.random.split(key, 6)

    def linear(kw, kb, fan_in, fan_out):
        bound = 1.0 / jnp.sqrt(jnp.asarray(fan_in, jnp.float32))
        w = jax.random.uniform(kw, (fan_in, fan_out), jnp.float32, -bound, bound)
        b = jax.random.uniform(kb, (1, fan_out), jnp.float32, -bound, bound)
        return w, b

    w1, b1 = linear(ks[0], ks[1], state_size, first_hid)
    w2, b2 = linear(ks[2], ks[3], first_hid, second_hid)
    w3, b3 = linear(ks[4], ks[5], second_hid, action_size)
    return {"w1": w1, "b1": b1, "w2": w2, "b2": b2, "w3": w3, "b3": b3}


def pad_params_for_kernel(params, lane=LANE):
    """Zero-pad hidden / output feature dims UP to a multiple of `lane`.

    Zero W columns + zero bias entries give exactly-zero padded activations
    (inert through ReLU), and zero W rows in the next layer ignore them, so
    the first `action_size` output columns are bit-identical to the unpadded
    network."""
    def pad2(a, rows, cols):
        return jnp.pad(a, ((0, rows - a.shape[0]), (0, cols - a.shape[1])))

    s = params["w1"].shape[0]                       # state_size kept as-is
    h1 = _round_up(params["w1"].shape[1], lane)
    h2 = _round_up(params["w2"].shape[1], lane)
    ao = _round_up(params["w3"].shape[1], lane)
    return {
        "w1": pad2(params["w1"], s, h1),
        "b1": pad2(params["b1"], 1, h1),
        "w2": pad2(params["w2"], h1, h2),
        "b2": pad2(params["b2"], 1, h2),
        "w3": pad2(params["w3"], h2, ao),
        "b3": pad2(params["b3"], 1, ao),
    }


if __name__ == "__main__":
    # Lunar Lander dims: state_size=8, action_size=4, hidden=64/64.
    # batch=300: exercises multi-tile streaming + ragged last block (no jnp.pad).
    # batch=1:   exercises the small-batch acting path.
    state_size, action_size, first_hid, second_hid = 8, 4, 64, 64
    batch = 300

    key = jax.random.PRNGKey(0)
    k_params, k_x = jax.random.split(key)
    params = init_qnetwork_params(k_params, state_size, action_size, first_hid, second_hid)
    padded = pad_params_for_kernel(params)
    x = jax.random.normal(k_x, (batch, state_size), jnp.float32)

    # Training path: full Q-values.
    q_values = jax.block_until_ready(qnetwork_forward(x, padded, action_size))
    # Target path: fused max over actions.
    q_max = jax.block_until_ready(qnetwork_max(x, padded, action_size))
    # Acting path: single state.
    q_act = jax.block_until_ready(qnetwork_forward(x[:1], padded, action_size))

    # Pure-JAX reference of the same forward pass (unpadded params).
    def ref(xs, p):
        h1 = jnp.maximum(xs @ p["w1"] + p["b1"], 0.0)
        h2 = jnp.maximum(h1 @ p["w2"] + p["b2"], 0.0)
        return h2 @ p["w3"] + p["b3"]

    expected = ref(x, params)
    assert q_values.shape == (batch, action_size)
    assert q_max.shape == (batch, 1)
    assert q_act.shape == (1, action_size)
    assert jnp.allclose(q_values, expected, atol=1e-5, rtol=1e-5)
    assert jnp.allclose(q_max, jnp.max(expected, axis=-1, keepdims=True), atol=1e-5, rtol=1e-5)
    assert jnp.allclose(q_act, expected[:1], atol=1e-5, rtol=1e-5)

    print("KERNEL_OK")
</pallas_src>

<mosaic_0001>
module attributes {stable_mosaic.version = 11 : i64} {
  func.func @qnetwork_kernel(%arg0: i32, %arg1: memref<152x8xf32, #tpu.memory_space<vmem>>, %arg2: memref<8x128xf32, #tpu.memory_space<vmem>>, %arg3: memref<1x128xf32, #tpu.memory_space<vmem>>, %arg4: memref<128x128xf32, #tpu.memory_space<vmem>>, %arg5: memref<1x128xf32, #tpu.memory_space<vmem>>, %arg6: memref<128x128xf32, #tpu.memory_space<vmem>>, %arg7: memref<1x128xf32, #tpu.memory_space<vmem>>, %arg8: memref<152x128xf32, #tpu.memory_space<vmem>>) attributes {dimension_semantics = [#tpu.dimension_semantics<parallel>], iteration_bounds = array<i64: 2>, scalar_prefetch = 0 : i64, scratch_operands = 0 : i64, tpu.core_type = #tpu.core_type<tc>, window_params = [{transform_indices = @transform_0, window_bounds = array<i64: 152, 8>}, {pipeline_mode = #tpu.pipeline_mode<synchronous>, transform_indices = @transform_1, window_bounds = array<i64: 8, 128>}, {pipeline_mode = #tpu.pipeline_mode<synchronous>, transform_indices = @transform_2, window_bounds = array<i64: 1, 128>}, {pipeline_mode = #tpu.pipeline_mode<synchronous>, transform_indices = @transform_3, window_bounds = array<i64: 128, 128>}, {pipeline_mode = #tpu.pipeline_mode<synchronous>, transform_indices = @transform_4, window_bounds = array<i64: 1, 128>}, {pipeline_mode = #tpu.pipeline_mode<synchronous>, transform_indices = @transform_5, window_bounds = array<i64: 128, 128>}, {pipeline_mode = #tpu.pipeline_mode<synchronous>, transform_indices = @transform_6, window_bounds = array<i64: 1, 128>}, {transform_indices = @transform_7, window_bounds = array<i64: 152, 128>}]} {
    %c0 = arith.constant 0 : index
    %c0_0 = arith.constant 0 : index
    %0 = vector.load %arg1[%c0, %c0_0] : memref<152x8xf32, #tpu.memory_space<vmem>>, vector<152x8xf32>
    %c0_1 = arith.constant 0 : index
    %c0_2 = arith.constant 0 : index
    %1 = vector.load %arg2[%c0_1, %c0_2] : memref<8x128xf32, #tpu.memory_space<vmem>>, vector<8x128xf32>
    %cst = arith.constant dense<0.000000e+00> : vector<152x128xf32>
    %2 = tpu.matmul %0, %1, %cst {dimension_numbers = #tpu.dot_dimension_numbers<[1], [0], [0], [1], [0, 0, 1, 1], [], []>} : vector<152x8xf32>, vector<8x128xf32>, vector<152x128xf32> -> vector<152x128xf32>
    %c0_3 = arith.constant 0 : index
    %c0_4 = arith.constant 0 : index
    %3 = vector.load %arg3[%c0_3, %c0_4] : memref<1x128xf32, #tpu.memory_space<vmem>>, vector<1x128xf32>
    %4 = vector.broadcast %3 : vector<1x128xf32> to vector<152x128xf32>
    %5 = arith.addf %2, %4 : vector<152x128xf32>
    %cst_5 = arith.constant 0.000000e+00 : f32
    %6 = vector.broadcast %cst_5 : f32 to vector<152x128xf32>
    %7 = arith.maximumf %5, %6 : vector<152x128xf32>
    %c0_6 = arith.constant 0 : index
    %c0_7 = arith.constant 0 : index
    %8 = vector.load %arg4[%c0_6, %c0_7] : memref<128x128xf32, #tpu.memory_space<vmem>>, vector<128x128xf32>
    %cst_8 = arith.constant dense<0.000000e+00> : vector<152x128xf32>
    %9 = tpu.matmul %7, %8, %cst_8 {dimension_numbers = #tpu.dot_dimension_numbers<[1], [0], [0], [1], [0, 0, 1, 1], [], []>} : vector<152x128xf32>, vector<128x128xf32>, vector<152x128xf32> -> vector<152x128xf32>
    %c0_9 = arith.constant 0 : index
    %c0_10 = arith.constant 0 : index
    %10 = vector.load %arg5[%c0_9, %c0_10] : memref<1x128xf32, #tpu.memory_space<vmem>>, vector<1x128xf32>
    %11 = vector.broadcast %10 : vector<1x128xf32> to vector<152x128xf32>
    %12 = arith.addf %9, %11 : vector<152x128xf32>
    %cst_11 = arith.constant 0.000000e+00 : f32
    %13 = vector.broadcast %cst_11 : f32 to vector<152x128xf32>
    %14 = arith.maximumf %12, %13 : vector<152x128xf32>
    %c0_12 = arith.constant 0 : index
    %c0_13 = arith.constant 0 : index
    %15 = vector.load %arg6[%c0_12, %c0_13] : memref<128x128xf32, #tpu.memory_space<vmem>>, vector<128x128xf32>
    %cst_14 = arith.constant dense<0.000000e+00> : vector<152x128xf32>
    %16 = tpu.matmul %14, %15, %cst_14 {dimension_numbers = #tpu.dot_dimension_numbers<[1], [0], [0], [1], [0, 0, 1, 1], [], []>} : vector<152x128xf32>, vector<128x128xf32>, vector<152x128xf32> -> vector<152x128xf32>
    %c0_15 = arith.constant 0 : index
    %c0_16 = arith.constant 0 : index
    %17 = vector.load %arg7[%c0_15, %c0_16] : memref<1x128xf32, #tpu.memory_space<vmem>>, vector<1x128xf32>
    %18 = vector.broadcast %17 : vector<1x128xf32> to vector<152x128xf32>
    %19 = arith.addf %16, %18 : vector<152x128xf32>
    %c0_17 = arith.constant 0 : index
    %c0_18 = arith.constant 0 : index
    %20 = vector.load %arg8[%c0_17, %c0_18] : memref<152x128xf32, #tpu.memory_space<vmem>>, vector<152x128xf32>
    tpu.vector_store %arg8[%c0_17, %c0_18], %19 {strides = array<i32>} : memref<152x128xf32, #tpu.memory_space<vmem>>, vector<152x128xf32>,
    return
  }
  func.func @transform_0(%arg0: i32) -> (i32, i32) {
    %c0_i32 = arith.constant 0 : i32
    %c0_i32_0 = arith.constant 0 : i32
    return %arg0, %c0_i32 : i32, i32
  }
  func.func @transform_1(%arg0: i32) -> (i32, i32) {
    %c0_i32 = arith.constant 0 : i32
    %c0_i32_0 = arith.constant 0 : i32
    %c0_i32_1 = arith.constant 0 : i32
    return %c0_i32, %c0_i32_0 : i32, i32
  }
  func.func @transform_2(%arg0: i32) -> (i32, i32) {
    %c0_i32 = arith.constant 0 : i32
    %c0_i32_0 = arith.constant 0 : i32
    %c0_i32_1 = arith.constant 0 : i32
    return %c0_i32, %c0_i32_0 : i32, i32
  }
  func.func @transform_3(%arg0: i32) -> (i32, i32) {
    %c0_i32 = arith.constant 0 : i32
    %c0_i32_0 = arith.constant 0 : i32
    %c0_i32_1 = arith.constant 0 : i32
    return %c0_i32, %c0_i32_0 : i32, i32
  }
  func.func @transform_4(%arg0: i32) -> (i32, i32) {
    %c0_i32 = arith.constant 0 : i32
    %c0_i32_0 = arith.constant 0 : i32
    %c0_i32_1 = arith.constant 0 : i32
    return %c0_i32, %c0_i32_0 : i32, i32
  }
  func.func @transform_5(%arg0: i32) -> (i32, i32) {
    %c0_i32 = arith.constant 0 : i32
    %c0_i32_0 = arith.constant 0 : i32
    %c0_i32_1 = arith.constant 0 : i32
    return %c0_i32, %c0_i32_0 : i32, i32
  }
  func.func @transform_6(%arg0: i32) -> (i32, i32) {
    %c0_i32 = arith.constant 0 : i32
    %c0_i32_0 = arith.constant 0 : i32
    %c0_i32_1 = arith.constant 0 : i32
    return %c0_i32, %c0_i32_0 : i32, i32
  }
  func.func @transform_7(%arg0: i32) -> (i32, i32) {
    %c0_i32 = arith.constant 0 : i32
    %c0_i32_0 = arith.constant 0 : i32
    return %arg0, %c0_i32 : i32, i32
  }
}

</mosaic_0001>

<bundles_post_ra>
// kernel: tpu_custom_call.1
= control target key start
LH: loop header
LB: loop body
LE: loop exit
PB: predicated region body
PF: predicated region fallthrough
CT: control target
= control target key end

     0   :  { %12 = vsyncpa [#allocation3], 0  ;;  %s2067_s0 = inlined_call_operand.vmem [shape: f32[300,8], index: 0, kind: input, shape index: {}]   ;;  %s2068_s1 = inlined_call_operand.vmem [shape: f32[8,128], index: 1, kind: input, shape index: {}]   ;;  %s2069_s2 = inlined_call_operand.vmem [shape: f32[1,128], index: 2, kind: input, shape index: {}]   ;;  %s2070_s3 = inlined_call_operand.vmem [shape: f32[128,128], index: 3, kind: input, shape index: {}]   ;;  %s2071_s4 = inlined_call_operand.vmem [shape: f32[1,128], index: 4, kind: input, shape index: {}]   ;;  %s2072_s5 = inlined_call_operand.vmem [shape: f32[128,128], index: 5, kind: input, shape index: {}]   ;;  %s2073_s6 = inlined_call_operand.vmem [shape: f32[1,128], index: 6, kind: input, shape index: {}]   ;;  %s2074_s7 = inlined_call_operand.hbm [shape: f32[300,128], index: 7, kind: output, shape index: {}]  }
   0x1   :  { %14 = vsyncpa [#allocation3 + $0x1], 0  ;;  %s1587_s24 = smov 0   ;;  %s1589_s25 = smov 0  }
   0x2   :  { %s1591_s26 = smov 0   ;;  %s1593_s27 = smov 0  }
   0x3 LB: > { %s1608_s28 = sadd.s32 4294967295, %s1539_s27   ;;  %s1024_s29 = sadd.s32 4294967294, %s1539_s27   ;;  %s1539_s27 = sphi %s1593_s27, %s2080_s27   ;;  %s1535_s26 = sphi %s1591_s26, %s2079_s26   ;;  %s1531_s25 = sphi %s1589_s25, %s2078_s25   ;;  %s1527_s24 = sphi %s1587_s24, %s2077_s24  }
   0x4   : > { %s1612_s30 = sadd.s32 1, %s1539_s27   ;;  %s179_s8 = sadd.s32 1, %s1535_s26 }
   0x5   : > { %s176_s9 = ssub.s32 %s1539_s27, %s1612_s30  ;;  %p189_p0 = scmp.ne.s32.totalorder %s1535_s26, %s1531_s25 }
   0x6   : > { %p177_p1 = scmp.eq.s32.totalorder %s176_s9, 0  ;;  %p190_p2 = scmp.eq.s32.totalorder %s1608_s28, 1 }
   0x7   : > { %p195_p3 = scmp.ne.s32.totalorder %s1531_s25, %s1527_s24  ;;  %p196_p4 = scmp.eq.s32.totalorder %s1024_s29, 1 }
   0x8   : > { %s1623_s10 = scalar_select %p177_p1, %s1535_s26, %s179_s8  }
   0x9   : > { %p1625_p5 = por %p190_p2, %p189_p0  ;;  %p1629_p6 = por %p196_p4, %p195_p3 }
   0xa   : > { %p1027_p7 = scmp.ge.s32.totalorder %s1539_s27, 1  ;;  %p241_p8 = scmp.lt.s32.totalorder %s1539_s27, 3 }
   0xc   : > { %p242_p9 = pnand %p1027_p7, %p241_p8 }
   0xd   : > { %v299_v0 = vld [vmem:[%s2068_s1] sm:$0xff] (!%p242_p9)  ;;  %s273_s15 = smul.u32 (!%p242_p9), 19, %s1608_s28  ;;  %v1541_v1 = vmov (!%p242_p9), 0.0   ;;  %vm1542_vm0 = vmmov (!%p242_p9), 0   ;;  %v1543_v2 = vmov (!%p242_p9), 0.0|0.0   ;;  %vm307_vm1 = vcmask (!%p242_p9), 64512  }
   0xe   : > { %245 = sbr.rel (%p242_p9) target bundleno = 758 (0x2f6), region = 48  ;;  %1145 = vmatprep.subr.mxu0 (!%p242_p9), %v1541_v1  ;;  %1147 = vmatprep.mubr.msk.f32.mxu0 (!%p242_p9), %vm1542_vm0, %v1541_v1  ;;  %v544_v3 = vld [vmem:[%s2070_s3] sm:$0xff] (!%p242_p9)  ;;  %v545_v4 = vld [vmem:[%s2070_s3 + $0x8] sm:$0xff] (!%p242_p9)  ;;  %v546_v9 = vld [vmem:[%s2070_s3 + $0x10] sm:$0xff] (!%p242_p9)  ;;  %s270_s20 = sand.u32 (!%p242_p9), 1, %s1531_s25  }
   0xf   : > { %1146 = vmatpush3.msra.mxu0 (!%p242_p9), %v299_v0  ;;  %p274_p10 = scmp.lt.s32.totalorder (!%p242_p9), %s273_s15, 37  ;;  %1430 = vmatprep.subr.mxu1 (!%p242_p9), %v1541_v1  ;;  %v1383_v7 = vpack.c.bf16 (!%p242_p9), %v545_v4, %v544_v3  ;;  %v547_v10 = vld [vmem:[%s2070_s3 + $0x18] sm:$0xff] (!%p242_p9)  ;;  %v548_v14 = vld [vmem:[%s2070_s3 + $0x20] sm:$0xff] (!%p242_p9)  ;;  %v549_v15 = vld [vmem:[%s2070_s3 + $0x28] sm:$0xff] (!%p242_p9)  ;;  %s1432_s21 = smul.u32 (!%p242_p9), 152, %s270_s20 }
  0x10   : > { %1431 = vmatpush3.msra.mxu1 (!%p242_p9), %v299_v0  ;;  %1177 = vmatprep.mubr.msk.f32.mxu1 (!%p242_p9), %vm1542_vm0, %v1541_v1  ;;  %v1386_v13 = vpack.c.bf16 (!%p242_p9), %v547_v10, %v546_v9  ;;  %v1389_v18 = vpack.c.bf16 (!%p242_p9), %v549_v15, %v548_v14  ;;  %v550_v19 = vld [vmem:[%s2070_s3 + $0x30] sm:$0xff] (!%p242_p9)  ;;  %v551_v20 = vld [vmem:[%s2070_s3 + $0x38] sm:$0xff] (!%p242_p9)  ;;  %v552_v24 = vld [vmem:[%s2070_s3 + $0x40] sm:$0xff] (!%p242_p9)  ;;  %s1054_s8 = smul.u32 (!%p242_p9), 2432, %s1608_s28  ;;  %s2026_s28 = scalar_lea.sflag (!%p242_p9), [#allocation3], %s270_s20 }
  0x11   : > { %1382 = vmatprep.subr.bf16.mxu1 (!%p242_p9), %v1543_v2  ;;  %1406 = vmatprep.subr.bf16.mxu0 (!%p242_p9), %v1543_v2  ;;  %v1392_v23 = vpack.c.bf16 (!%p242_p9), %v551_v20, %v550_v19  ;;  %v553_v25 = vld [vmem:[%s2070_s3 + $0x48] sm:$0xff] (!%p242_p9)  ;;  %v554_v29 = vld [vmem:[%s2070_s3 + $0x50] sm:$0xff] (!%p242_p9)  ;;  %v555_v30 = vld [vmem:[%s2070_s3 + $0x58] sm:$0xff] (!%p242_p9)  ;;  %s1976_s29 = scalar_lea.vmem (!%p242_p9), [#allocation2], %s1432_s21 }
  0x12   : > { %v1395_v28 = vpack.c.bf16 (!%p242_p9), %v553_v25, %v552_v24  ;;  %v1398_v33 = vpack.c.bf16 (!%p242_p9), %v555_v30, %v554_v29  ;;  %v556_v34 = vld [vmem:[%s2070_s3 + $0x60] sm:$0xff] (!%p242_p9)  ;;  %v557_v35 = vld [vmem:[%s2070_s3 + $0x68] sm:$0xff] (!%p242_p9)  ;;  %v558_v43 = vld [vmem:[%s2070_s3 + $0x70] sm:$0xff] (!%p242_p9)  ;;  %s2018_s14 = scalar_lea.hbm (!%p242_p9), %s2074_s7, %s1054_s8 }
  0x13   : > { %v1401_v38 = vpack.c.bf16 (!%p242_p9), %v557_v35, %v556_v34  ;;  %v559_v44 = vld [vmem:[%s2070_s3 + $0x78] sm:$0xff] (!%p242_p9)  ;;  %v746_v46 = vld [vmem:[%s2072_s5] sm:$0xff] (!%p242_p9)  ;;  %v747_v47 = vld [vmem:[%s2072_s5 + $0x8] sm:$0xff] (!%p242_p9) }
  0x14   : > { %v1404_v45 = vpack.c.bf16 (!%p242_p9), %v559_v44, %v558_v43  ;;  %v748_v48 = vld [vmem:[%s2072_s5 + $0x10] sm:$0xff] (!%p242_p9)  ;;  %v1407_v49 = vpack.c.bf16 (!%p242_p9), %v747_v47, %v746_v46  ;;  %v749_v50 = vld [vmem:[%s2072_s5 + $0x18] sm:$0xff] (!%p242_p9)  ;;  %v750_v52 = vld [vmem:[%s2072_s5 + $0x20] sm:$0xff] (!%p242_p9) }
  0x15   : > { %s2082_s15 = smov (!%p274_p10, %s273_s15), 37  ;;  %v1410_v51 = vpack.c.bf16 %v749_v50, %v748_v48  ;;  %v751_v53 = vld [vmem:[%s2072_s5 + $0x28] sm:$0xff]  ;;  %v752_v55 = vld [vmem:[%s2072_s5 + $0x30] sm:$0xff]  ;;  %v753_v56 = vld [vmem:[%s2072_s5 + $0x38] sm:$0xff] }
  0x16   : > { %s1028_s16 = sshll.u32 %s2082_s15, 3  ;;  %v1413_v54 = vpack.c.bf16 %v751_v53, %v750_v52  ;;  %v1416_v57 = vpack.c.bf16 %v753_v56, %v752_v55  ;;  %v754_v58 = vld [vmem:[%s2072_s5 + $0x40] sm:$0xff]  ;;  %v755_v59 = vld [vmem:[%s2072_s5 + $0x48] sm:$0xff]  ;;  %v756_v61 = vld [vmem:[%s2072_s5 + $0x50] sm:$0xff] }
  0x17   : > { %s1650_s19 = scalar_lea.vmem %s2067_s0, %s1028_s16  ;;  %v1419_v60 = vpack.c.bf16 %v755_v59, %v754_v58  ;;  %v757_v62 = vld [vmem:[%s2072_s5 + $0x58] sm:$0xff]  ;;  %v758_v0 = vld [vmem:[%s2072_s5 + $0x60] sm:$0xff]  ;;  %v759_v3 = vld [vmem:[%s2072_s5 + $0x68] sm:$0xff]  ;;  %s1544_s16 = smov [#allocation2]  }
  0x18   : > { %v280_v5 = vld [vmem:[%s1650_s19] sm:$0xff]  ;;  %v281_v6 = vld [vmem:[%s1650_s19 + $0x8] sm:$0xff]  ;;  %v290_v8 = vld [vmem:[%s1650_s19 + $0x50] sm:$0xff]  ;;  %v1422_v63 = vpack.c.bf16 %v757_v62, %v756_v61  ;;  %v1425_v4 = vpack.c.bf16 %v759_v3, %v758_v0  ;;  %s1481_s17 = sshll.u32 %s1544_s16, 4  ;;  %s1482_s17 = int_to_ptr.vmem [resolvable:$false] %s1481_s17 }
  0x19   : > { %1148 = vmatmul.mubr.msk.f32.vlgmr.msra.gmra.mrb[0].mxu0 %vm307_vm1, %v280_v5  ;;  %1178 = vmatmul.mubr.msk.f32.vlgmr.msra.gmra.mrb[0].mxu1 %vm307_vm1, %v290_v8  ;;  %v291_v11 = vld [vmem:[%s1650_s19 + $0x58] sm:$0xff]  ;;  %v282_v12 = vld [vmem:[%s1650_s19 + $0x10] sm:$0xff]  ;;  %v292_v16 = vld [vmem:[%s1650_s19 + $0x60] sm:$0xff]  ;;  %s1483_s18 = scalar_lea.vmem %s1482_s17, 4864 }
  0x1a   : > { %1150 = vmatprep.mubr.msk.f32.mxu0 %vm1542_vm0, %v1541_v1  ;;  %1180 = vmatprep.mubr.msk.f32.mxu1 %vm1542_vm0, %v1541_v1  ;;  %v283_v17 = vld [vmem:[%s1650_s19 + $0x18] sm:$0xff]  ;;  %v293_v21 = vld [vmem:[%s1650_s19 + $0x68] sm:$0xff]  ;;  %v284_v22 = vld [vmem:[%s1650_s19 + $0x20] sm:$0xff] }
  0x1b   : > { %1384 = vmatpush3.bf16.msra.mxu1 %v1383_v7  ;;  %v294_v26 = vld [vmem:[%s1650_s19 + $0x70] sm:$0xff]  ;;  %v285_v27 = vld [vmem:[%s1650_s19 + $0x28] sm:$0xff]  ;;  %v295_v31 = vld [vmem:[%s1650_s19 + $0x78] sm:$0xff]  ;;  %1408 = vmatpush3.bf16.msra.mxu0 %v1407_v49 }
  0x1c   : > { %1385 = vmatprep.subr.bf16.mxu1 %v1543_v2  ;;  %v286_v32 = vld [vmem:[%s1650_s19 + $0x30] sm:$0xff]  ;;  %v296_v36 = vld [vmem:[%s1650_s19 + $0x80] sm:$0xff]  ;;  %v287_v37 = vld [vmem:[%s1650_s19 + $0x38] sm:$0xff]  ;;  %1409 = vmatprep.subr.bf16.mxu0 %v1543_v2 }
  0x1d   : > { %1151 = vmatmul.mubr.msk.f32.gmra.mrb[2].mxu0 %vm307_vm1, %v281_v6  ;;  %1181 = vmatmul.mubr.msk.f32.gmra.mrb[2].mxu1 %vm307_vm1, %v291_v11  ;;  %v297_v39 = vld [vmem:[%s1650_s19 + $0x88] sm:$0xff]  ;;  %v288_v40 = vld [vmem:[%s1650_s19 + $0x40] sm:$0xff]  ;;  %v298_v41 = vld [vmem:[%s1650_s19 + $0x90] sm:$0xff] }
  0x1e   : > { %1153 = vmatprep.mubr.msk.f32.mxu0 %vm1542_vm0, %v1541_v1  ;;  %1183 = vmatprep.mubr.msk.f32.mxu1 %vm1542_vm0, %v1541_v1  ;;  %v289_v42 = vld [vmem:[%s1650_s19 + $0x48] sm:$0xff]  ;;  %v1835_v5 = vld [vmem:[%s2069_s2] ss:$0 sm:$0xff]  ;;  %s962_s19 = sshll.u32 %s1976_s29, 4  ;;  %s2020_s19 = int_to_ptr.vmem [resolvable:$true] %s962_s19 }
  0x1f   : > { %1387 = vmatpush3.bf16.msra.mxu1 %v1386_v13  ;;  %1411 = vmatpush3.bf16.msra.mxu0 %v1410_v51  ;;  %s1477_s15 = scalar_lea.vmem %s2020_s19, 2432  ;;  %p1484_p0 = scmp.lt.s32.totalorder %s2020_s19, %s1482_s17 }
  0x20   : > { %1388 = vmatprep.subr.bf16.mxu1 %v1543_v2  ;;  %1412 = vmatprep.subr.bf16.mxu0 %v1543_v2  ;;  %p1478_p11 = scmp.ne.s32.totalorder %s2020_s19, %s1477_s15  ;;  %p1485_p1 = scmp.lt.s32.totalorder %s1483_s18, %s1477_s15 }
  0x21   : > { %1154 = vmatmul.mubr.msk.f32.gmra.mrb[4].mxu0 %vm307_vm1, %v282_v12  ;;  %1184 = vmatmul.mubr.msk.f32.gmra.mrb[4].mxu1 %vm307_vm1, %v292_v16 }
  0x22   : > { %1156 = vmatprep.mubr.msk.f32.mxu0 %vm1542_vm0, %v1541_v1  ;;  %1186 = vmatprep.mubr.msk.f32.mxu1 %vm1542_vm0, %v1541_v1  ;;  %p1479_p12 = pnand %p1478_p11, %p1625_p5  ;;  %p1486_p2 = por %p1485_p1, %p1484_p0 }
  0x23   : > { %1390 = vmatpush3.bf16.msra.mxu1 %v1389_v18  ;;  %1414 = vmatpush3.bf16.msra.mxu0 %v1413_v54 }
  0x24   : > { %1391 = vmatprep.subr.bf16.mxu1 %v1543_v2  ;;  %1415 = vmatprep.subr.bf16.mxu0 %v1543_v2  ;;  %p1480_p13 = pneg %p1479_p12 }
  0x25   : > { %1157 = vmatmul.mubr.msk.f32.gmra.mrb[6].mxu0 %vm307_vm1, %v283_v17  ;;  %1187 = vmatmul.mubr.msk.f32.gmra.mrb[6].mxu1 %vm307_vm1, %v293_v21 }
  0x26   : > { %1159 = vmatprep.mubr.msk.f32.mxu0 %vm1542_vm0, %v1541_v1  ;;  %1189 = vmatprep.mubr.msk.f32.mxu1 %vm1542_vm0, %v1541_v1  ;;  %p1487_p3 = pnand %p1486_p2, %p1480_p13 }
  0x27   : > { %1393 = vmatpush3.bf16.msra.mxu1 %v1392_v23  ;;  %1417 = vmatpush3.bf16.msra.mxu0 %v1416_v57 }
  0x28   : > { %1394 = vmatprep.subr.bf16.mxu1 %v1543_v2  ;;  %1418 = vmatprep.subr.bf16.mxu0 %v1543_v2 }
  0x29   : > { %1160 = vmatmul.mubr.msk.f32.gmra.mrb[8].mxu0 %vm307_vm1, %v284_v22  ;;  %1190 = vmatmul.mubr.msk.f32.gmra.mrb[8].mxu1 %vm307_vm1, %v294_v26 }
  0x2a   : > { %1162 = vmatprep.mubr.msk.f32.mxu0 %vm1542_vm0, %v1541_v1  ;;  %1192 = vmatprep.mubr.msk.f32.mxu1 %vm1542_vm0, %v1541_v1 }
  0x2b   : > { %1396 = vmatpush3.bf16.msra.mxu1 %v1395_v28  ;;  %1420 = vmatpush3.bf16.msra.mxu0 %v1419_v60 }
  0x2c   : > { %1397 = vmatprep.subr.bf16.mxu1 %v1543_v2  ;;  %1421 = vmatprep.subr.bf16.mxu0 %v1543_v2 }
  0x2d   : > { %1163 = vmatmul.mubr.msk.f32.gmra.mrb[10].mxu0 %vm307_vm1, %v285_v27  ;;  %1193 = vmatmul.mubr.msk.f32.gmra.mrb[10].mxu1 %vm307_vm1, %v295_v31 }
  0x2e   : > { %1165 = vmatprep.mubr.msk.f32.mxu0 %vm1542_vm0, %v1541_v1  ;;  %1195 = vmatprep.mubr.msk.f32.mxu1 %vm1542_vm0, %v1541_v1 }
  0x2f   : > { %1399 = vmatpush3.bf16.msra.mxu1 %v1398_v33  ;;  %1423 = vmatpush3.bf16.msra.mxu0 %v1422_v63 }
  0x30   : > { %1400 = vmatprep.subr.bf16.mxu1 %v1543_v2  ;;  %1424 = vmatprep.subr.bf16.mxu0 %v1543_v2 }
  0x31   : > { %1166 = vmatmul.mubr.msk.f32.gmra.mrb[12].mxu0 %vm307_vm1, %v286_v32  ;;  %1196 = vmatmul.mubr.msk.f32.gmra.mrb[12].mxu1 %vm307_vm1, %v296_v36 }
  0x32   : > { %1168 = vmatprep.mubr.msk.f32.mxu0 %vm1542_vm0, %v1541_v1  ;;  %1198 = vmatprep.mubr.msk.f32.mxu1 %vm1542_vm0, %v1541_v1 }
  0x33   : > { %1402 = vmatpush3.bf16.msra.mxu1 %v1401_v38  ;;  %1426 = vmatpush3.bf16.msra.mxu0 %v1425_v4 }
  0x34   : > { %1403 = vmatprep.subr.bf16.mxu1 %v1543_v2  ;;  %1427 = vmatprep.subr.bf16.mxu0 %v1543_v2 }
  0x35   : > { %1169 = vmatmul.mubr.msk.f32.gmra.mrb[14].mxu0 %vm307_vm1, %v287_v37  ;;  %1199 = vmatmul.mubr.msk.f32.gmra.mrb[14].mxu1 %vm307_vm1, %v297_v39 }
  0x36   : > { %1171 = vmatprep.mubr.msk.f32.mxu0 %vm1542_vm0, %v1541_v1  ;;  %1201 = vmatprep.mubr.msk.f32.mxu1 %vm1542_vm0, %v1541_v1 }
  0x37   : > { %1405 = vmatpush3.bf16.msra.mxu1 %v1404_v45 }
  0x39   : > { %1172 = vmatmul.mubr.msk.f32.gmra.mrb[16].mxu0 %vm307_vm1, %v288_v40  ;;  %1202 = vmatmul.mubr.msk.f32.gmra.mrb[16].mxu1 %vm307_vm1, %v298_v41 }
  0x3a   : > { %1174 = vmatprep.mubr.msk.f32.mxu0 %vm1542_vm0, %v1541_v1  ;;  %1236 = vmatprep.mubr.msk.f32.mxu1 %vm1542_vm0, %v1541_v1 }
  0x3d   : > { %1175 = vmatmul.mubr.msk.f32.gmra.mrb[18].mxu0 %vm307_vm1, %v289_v42 }
  0x3e   : > { %1325 = vmatprep.mubr.msk.f32.mxu0 %vm1542_vm0, %v1541_v1 }
  0xec   : > { %v431_v6 = vpop.f32.mrb[0].mxu0  ;;  %v1838_v10 = vpop.f32.mrb[0].mxu1 }
  0xed   : > { %v432_v7 = vadd.f32 %v1835_v5, %v431_v6  ;;  %v1149_v8 = vpop.f32.mrb[1].mxu0  ;;  %v1179_v12 = vpop.f32.mrb[1].mxu1  ;;  %v482_v3 = vadd.f32 %v1835_v5, %v1838_v10 }
  0xef   : > { %v525_v9 = vmax.f32 %v432_v7, 0.0  ;;  %v535_v6 = vmax.f32 %v482_v3, 0.0 }
  0xf0   : > { %v436_v11 = vpop.f32.mrb[2].mxu0  ;;  %v1843_v15 = vpop.f32.mrb[2].mxu1 }
  0xf1   : > { %v437_v13 = vadd.f32 %v1835_v5, %v436_v11  ;;  %v1152_v14 = vpop.f32.mrb[3].mxu0  ;;  %1237 = vmatmul.mubr.f32.vlgmr.msra.gmra.mrb[18].mxu1 %v525_v9  ;;  %v1182_v17 = vpop.f32.mrb[3].mxu1  ;;  %v487_v7 = vadd.f32 %v1835_v5, %v1843_v15 }
  0xf2   : > { %1239 = vmatprep.mubr.msk.f32.mxu1 %vm1542_vm0, %v1541_v1 }
  0xf3   : > { %v526_v2 = vmax.f32 %v437_v13, 0.0  ;;  %v536_v8 = vmax.f32 %v487_v7, 0.0 }
  0xf4   : > { %v441_v16 = vpop.f32.mrb[4].mxu0  ;;  %v1848_v21 = vpop.f32.mrb[4].mxu1 }
  0xf5   : > { %v442_v18 = vadd.f32 %v1835_v5, %v441_v16  ;;  %v1155_v19 = vpop.f32.mrb[5].mxu0  ;;  %1240 = vmatmul.mubr.f32.gmra.mrb[20].mxu1 %v526_v2  ;;  %v1185_v23 = vpop.f32.mrb[5].mxu1  ;;  %v492_v9 = vadd.f32 %v1835_v5, %v1848_v21  ;;  %v1910_v21 = vld [vmem:[%s2071_s4] ss:$0 sm:$0xff] }
  0xf6   : > { %1242 = vmatprep.mubr.msk.f32.mxu1 %vm1542_vm0, %v1541_v1  ;;  %v761_v19 = vld [vmem:[%s2072_s5 + $0x78] sm:$0xff] }
  0xf7   : > { %v527_v20 = vmax.f32 %v442_v18, 0.0  ;;  %v537_v10 = vmax.f32 %v492_v9, 0.0 }
  0xf8   : > { %v446_v22 = vpop.f32.mrb[6].mxu0  ;;  %v496_v27 = vpop.f32.mrb[6].mxu1 }
  0xf9   : > { %v447_v24 = vadd.f32 %v1835_v5, %v446_v22  ;;  %v1158_v25 = vpop.f32.mrb[7].mxu0  ;;  %1243 = vmatmul.mubr.f32.gmra.mrb[22].mxu1 %v527_v20  ;;  %v1188_v29 = vpop.f32.mrb[7].mxu1  ;;  %v497_v11 = vadd.f32 %v1835_v5, %v496_v27 }
  0xfa   : > { %1245 = vmatprep.mubr.msk.f32.mxu1 %vm1542_vm0, %v1541_v1 }
  0xfb   : > { %v528_v26 = vmax.f32 %v447_v24, 0.0  ;;  %v538_v12 = vmax.f32 %v497_v11, 0.0 }
  0xfc   : > { %v451_v28 = vpop.f32.mrb[8].mxu0  ;;  %v501_v33 = vpop.f32.mrb[8].mxu1 }
  0xfd   : > { %v452_v30 = vadd.f32 %v1835_v5, %v451_v28  ;;  %v1161_v31 = vpop.f32.mrb[9].mxu0  ;;  %1246 = vmatmul.mubr.f32.gmra.mrb[24].mxu1 %v528_v26  ;;  %v1191_v35 = vpop.f32.mrb[9].mxu1  ;;  %v502_v13 = vadd.f32 %v1835_v5, %v501_v33 }
  0xfe   : > { %1248 = vmatprep.mubr.msk.f32.mxu1 %vm1542_vm0, %v1541_v1 }
  0xff   : > { %v529_v32 = vmax.f32 %v452_v30, 0.0  ;;  %v539_v14 = vmax.f32 %v502_v13, 0.0 }
 0x100   : > { %v456_v34 = vpop.f32.mrb[10].mxu0  ;;  %v506_v39 = vpop.f32.mrb[10].mxu1 }
 0x101   : > { %v457_v36 = vadd.f32 %v1835_v5, %v456_v34  ;;  %v1164_v37 = vpop.f32.mrb[11].mxu0  ;;  %1249 = vmatmul.mubr.f32.gmra.mrb[26].mxu1 %v529_v32  ;;  %v1194_v41 = vpop.f32.mrb[11].mxu1  ;;  %v507_v2 = vadd.f32 %v1835_v5, %v506_v39 }
 0x102   : > { %1251 = vmatprep.mubr.msk.f32.mxu1 %vm1542_vm0, %v1541_v1 }
 0x103   : > { %v530_v38 = vmax.f32 %v457_v36, 0.0  ;;  %v540_v15 = vmax.f32 %v507_v2, 0.0 }
 0x104   : > { %v461_v40 = vpop.f32.mrb[12].mxu0  ;;  %v511_v45 = vpop.f32.mrb[12].mxu1 }
 0x105   : > { %v462_v42 = vadd.f32 %v1835_v5, %v461_v40  ;;  %v1167_v43 = vpop.f32.mrb[13].mxu0  ;;  %1252 = vmatmul.mubr.f32.gmra.mrb[28].mxu1 %v530_v38  ;;  %v512_v47 = vadd.f32 %v1835_v5, %v511_v45  ;;  %v1197_v48 = vpop.f32.mrb[13].mxu1 }
 0x106   : > { %1254 = vmatprep.mubr.msk.f32.mxu1 %vm1542_vm0, %v1541_v1 }
 0x107   : > { %v531_v44 = vmax.f32 %v462_v42, 0.0  ;;  %v541_v16 = vmax.f32 %v512_v47, 0.0 }
 0x108   : > { %v466_v46 = vpop.f32.mrb[14].mxu0  ;;  %v516_v52 = vpop.f32.mrb[14].mxu1 }
 0x109   : > { %v467_v49 = vadd.f32 %v1835_v5, %v466_v46  ;;  %v1170_v50 = vpop.f32.mrb[15].mxu0  ;;  %1255 = vmatmul.mubr.f32.gmra.mrb[30].mxu1 %v531_v44  ;;  %v517_v54 = vadd.f32 %v1835_v5, %v516_v52  ;;  %v1200_v55 = vpop.f32.mrb[15].mxu1 }
 0x10a   : > { %1257 = vmatprep.mubr.msk.f32.mxu1 %vm1542_vm0, %v1541_v1 }
 0x10b   : > { %v532_v51 = vmax.f32 %v467_v49, 0.0  ;;  %v542_v17 = vmax.f32 %v517_v54, 0.0 }
 0x10c   : > { %v471_v53 = vpop.f32.mrb[16].mxu0  ;;  %v521_v59 = vpop.f32.mrb[16].mxu1 }
 0x10d   : > { %v472_v56 = vadd.f32 %v1835_v5, %v471_v53  ;;  %v1173_v57 = vpop.f32.mrb[17].mxu0  ;;  %1258 = vmatmul.mubr.f32.gmra.mrb[32].mxu1 %v532_v51  ;;  %v522_v61 = vadd.f32 %v1835_v5, %v521_v59  ;;  %v1203_v62 = vpop.f32.mrb[17].mxu1 }
 0x10e   : > { %1260 = vmatprep.mubr.msk.f32.mxu1 %vm1542_vm0, %v1541_v1 }
 0x10f   : > { %v533_v58 = vmax.f32 %v472_v56, 0.0  ;;  %v543_v18 = vmax.f32 %v522_v61, 0.0 }
 0x110   : > { %v476_v60 = vpop.f32.mrb[18].mxu0 }
 0x111   : > { %v477_v63 = vadd.f32 %v1835_v5, %v476_v60  ;;  %v1176_v0 = vpop.f32.mrb[19].mxu0  ;;  %1261 = vmatmul.mubr.f32.gmra.mrb[34].mxu1 %v533_v58  ;;  %v760_v5 = vld [vmem:[%s2072_s5 + $0x70] sm:$0xff] }
 0x112   : > { %1263 = vmatprep.mubr.msk.f32.mxu1 %vm1542_vm0, %v1541_v1  ;;  %v1428_v20 = vpack.c.bf16 %v761_v19, %v760_v5 }
 0x113   : > { %v534_v4 = vmax.f32 %v477_v63, 0.0 }
 0x114   : > { %1429 = vmatpush3.bf16.msra.mxu0 %v1428_v20 }
 0x115   : > { %1264 = vmatmul.mubr.f32.gmra.mrb[36].mxu1 %v534_v4 }
 0x116   : > { %1266 = vmatprep.mubr.msk.f32.mxu1 %vm1542_vm0, %v1541_v1 }
 0x119   : > { %1267 = vmatmul.mubr.f32.gmra.mrb[38].mxu1 %v535_v6 }
 0x11a   : > { %1269 = vmatprep.mubr.msk.f32.mxu1 %vm1542_vm0, %v1541_v1 }
 0x11d   : > { %1270 = vmatmul.mubr.f32.gmra.mrb[40].mxu1 %v536_v8 }
 0x11e   : > { %1272 = vmatprep.mubr.msk.f32.mxu1 %vm1542_vm0, %v1541_v1 }
 0x121   : > { %1273 = vmatmul.mubr.f32.gmra.mrb[42].mxu1 %v537_v10 }
 0x122   : > { %1275 = vmatprep.mubr.msk.f32.mxu1 %vm1542_vm0, %v1541_v1 }
 0x125   : > { %1276 = vmatmul.mubr.f32.gmra.mrb[44].mxu1 %v538_v12 }
 0x126   : > { %1278 = vmatprep.mubr.msk.f32.mxu1 %vm1542_vm0, %v1541_v1 }
 0x129   : > { %1279 = vmatmul.mubr.f32.gmra.mrb[46].mxu1 %v539_v14 }
 0x12a   : > { %1281 = vmatprep.mubr.msk.f32.mxu1 %vm1542_vm0, %v1541_v1 }
 0x12d   : > { %1282 = vmatmul.mubr.f32.gmra.mrb[48].mxu1 %v540_v15 }
 0x12e   : > { %1284 = vmatprep.mubr.msk.f32.mxu1 %vm1542_vm0, %v1541_v1 }
 0x131   : > { %1285 = vmatmul.mubr.f32.gmra.mrb[50].mxu1 %v541_v16 }
 0x132   : > { %1287 = vmatprep.mubr.msk.f32.mxu1 %vm1542_vm0, %v1541_v1 }
 0x135   : > { %1288 = vmatmul.mubr.f32.gmra.mrb[52].mxu1 %v542_v17 }
 0x136   : > { %1290 = vmatprep.mubr.msk.f32.mxu1 %vm1542_vm0, %v1541_v1 }
 0x139   : > { %1291 = vmatmul.mubr.f32.gmra.mrb[54].mxu1 %v543_v18 }
 0x1c4   : > { %v633_v22 = vpop.f32.mrb[18].mxu1 }
 0x1c5   : > { %v634_v23 = vadd.f32 %v1910_v21, %v633_v22  ;;  %v1238_v24 = vpop.f32.mrb[19].mxu1 }
 0x1c7   : > { %v727_v25 = vmax.f32 %v634_v23, 0.0 }
 0x1c8   : > { %v638_v26 = vpop.f32.mrb[20].mxu1 }
 0x1c9   : > { %v639_v27 = vadd.f32 %v1910_v21, %v638_v26  ;;  %v1241_v28 = vpop.f32.mrb[21].mxu1  ;;  %1326 = vmatmul.mubr.f32.vlgmr.msra.gmra.mrb[20].mxu0 %v727_v25 }
 0x1ca   : > { %1328 = vmatprep.mubr.msk.f32.mxu0 %vm1542_vm0, %v1541_v1 }
 0x1cb   : > { %v728_v29 = vmax.f32 %v639_v27, 0.0 }
 0x1cc   : > { %v643_v30 = vpop.f32.mrb[22].mxu1 }
 0x1cd   : > { %v644_v31 = vadd.f32 %v1910_v21, %v643_v30  ;;  %v1244_v32 = vpop.f32.mrb[23].mxu1  ;;  %1329 = vmatmul.mubr.f32.gmra.mrb[22].mxu0 %v728_v29 }
 0x1ce   : > { %1331 = vmatprep.mubr.msk.f32.mxu0 %vm1542_vm0, %v1541_v1 }
 0x1cf   : > { %v729_v33 = vmax.f32 %v644_v31, 0.0 }
 0x1d0   : > { %v648_v34 = vpop.f32.mrb[24].mxu1 }
 0x1d1   : > { %v649_v35 = vadd.f32 %v1910_v21, %v648_v34  ;;  %v1247_v36 = vpop.f32.mrb[25].mxu1  ;;  %1332 = vmatmul.mubr.f32.gmra.mrb[24].mxu0 %v729_v33 }
 0x1d2   : > { %1334 = vmatprep.mubr.msk.f32.mxu0 %vm1542_vm0, %v1541_v1  ;;  %v1973_v36 = vld [vmem:[%s2073_s6] ss:$0 sm:$0xff] }
 0x1d3   : > { %v730_v37 = vmax.f32 %v649_v35, 0.0 }
 0x1d4   : > { %v653_v38 = vpop.f32.mrb[26].mxu1 }
 0x1d5   : > { %v654_v39 = vadd.f32 %v1910_v21, %v653_v38  ;;  %v1250_v40 = vpop.f32.mrb[27].mxu1  ;;  %1335 = vmatmul.mubr.f32.gmra.mrb[26].mxu0 %v730_v37 }
 0x1d6   : > { %1337 = vmatprep.mubr.msk.f32.mxu0 %vm1542_vm0, %v1541_v1 }
 0x1d7   : > { %v731_v41 = vmax.f32 %v654_v39, 0.0 }
 0x1d8   : > { %v658_v42 = vpop.f32.mrb[28].mxu1 }
 0x1d9   : > { %v659_v43 = vadd.f32 %v1910_v21, %v658_v42  ;;  %v1253_v44 = vpop.f32.mrb[29].mxu1  ;;  %1338 = vmatmul.mubr.f32.gmra.mrb[28].mxu0 %v731_v41 }
 0x1da   : > { %1340 = vmatprep.mubr.msk.f32.mxu0 %vm1542_vm0, %v1541_v1 }
 0x1db   : > { %v732_v45 = vmax.f32 %v659_v43, 0.0 }
 0x1dc   : > { %v663_v46 = vpop.f32.mrb[30].mxu1 }
 0x1dd   : > { %v664_v47 = vadd.f32 %v1910_v21, %v663_v46  ;;  %v1256_v48 = vpop.f32.mrb[31].mxu1  ;;  %1341 = vmatmul.mubr.f32.gmra.mrb[30].mxu0 %v732_v45 }
 0x1de   : > { %1343 = vmatprep.mubr.msk.f32.mxu0 %vm1542_vm0, %v1541_v1 }
 0x1df   : > { %v733_v49 = vmax.f32 %v664_v47, 0.0 }
 0x1e0   : > { %v668_v50 = vpop.f32.mrb[32].mxu1 }
 0x1e1   : > { %v669_v51 = vadd.f32 %v1910_v21, %v668_v50  ;;  %v1259_v52 = vpop.f32.mrb[33].mxu1  ;;  %1344 = vmatmul.mubr.f32.gmra.mrb[32].mxu0 %v733_v49 }
 0x1e2   : > { %1346 = vmatprep.mubr.msk.f32.mxu0 %vm1542_vm0, %v1541_v1 }
 0x1e3   : > { %v734_v53 = vmax.f32 %v669_v51, 0.0 }
 0x1e4   : > { %v673_v54 = vpop.f32.mrb[34].mxu1 }
 0x1e5   : > { %v674_v55 = vadd.f32 %v1910_v21, %v673_v54  ;;  %v1262_v56 = vpop.f32.mrb[35].mxu1  ;;  %1347 = vmatmul.mubr.f32.gmra.mrb[34].mxu0 %v734_v53 }
 0x1e6   : > { %1349 = vmatprep.mubr.msk.f32.mxu0 %vm1542_vm0, %v1541_v1 }
 0x1e7   : > { %v735_v57 = vmax.f32 %v674_v55, 0.0 }
 0x1e8   : > { %v678_v58 = vpop.f32.mrb[36].mxu1 }
 0x1e9   : > { %v679_v59 = vadd.f32 %v1910_v21, %v678_v58  ;;  %v1265_v60 = vpop.f32.mrb[37].mxu1  ;;  %1350 = vmatmul.mubr.f32.gmra.mrb[36].mxu0 %v735_v57 }
 0x1ea   : > { %1352 = vmatprep.mubr.msk.f32.mxu0 %vm1542_vm0, %v1541_v1 }
 0x1eb   : > { %v736_v61 = vmax.f32 %v679_v59, 0.0 }
 0x1ec   : > { %v683_v62 = vpop.f32.mrb[38].mxu1 }
 0x1ed   : > { %v684_v63 = vadd.f32 %v1910_v21, %v683_v62  ;;  %v1268_v0 = vpop.f32.mrb[39].mxu1  ;;  %1353 = vmatmul.mubr.f32.gmra.mrb[38].mxu0 %v736_v61 }
 0x1ee   : > { %1355 = vmatprep.mubr.msk.f32.mxu0 %vm1542_vm0, %v1541_v1 }
 0x1ef   : > { %v737_v3 = vmax.f32 %v684_v63, 0.0 }
 0x1f0   : > { %v688_v4 = vpop.f32.mrb[40].mxu1 }
 0x1f1   : > { %v689_v6 = vadd.f32 %v1910_v21, %v688_v4  ;;  %v1271_v7 = vpop.f32.mrb[41].mxu1  ;;  %1356 = vmatmul.mubr.f32.gmra.mrb[40].mxu0 %v737_v3 }
 0x1f2   : > { %1358 = vmatprep.mubr.msk.f32.mxu0 %vm1542_vm0, %v1541_v1 }
 0x1f3   : > { %v738_v8 = vmax.f32 %v689_v6, 0.0 }
 0x1f4   : > { %v693_v9 = vpop.f32.mrb[42].mxu1 }
 0x1f5   : > { %v694_v10 = vadd.f32 %v1910_v21, %v693_v9  ;;  %v1274_v11 = vpop.f32.mrb[43].mxu1  ;;  %1359 = vmatmul.mubr.f32.gmra.mrb[42].mxu0 %v738_v8 }
 0x1f6   : > { %1361 = vmatprep.mubr.msk.f32.mxu0 %vm1542_vm0, %v1541_v1 }
 0x1f7   : > { %v739_v12 = vmax.f32 %v694_v10, 0.0 }
 0x1f8   : > { %v698_v13 = vpop.f32.mrb[44].mxu1 }
 0x1f9   : > { %v699_v14 = vadd.f32 %v1910_v21, %v698_v13  ;;  %v1277_v2 = vpop.f32.mrb[45].mxu1  ;;  %1362 = vmatmul.mubr.f32.gmra.mrb[44].mxu0 %v739_v12 }
 0x1fa   : > { %1364 = vmatprep.mubr.msk.f32.mxu0 %vm1542_vm0, %v1541_v1 }
 0x1fb   : > { %v740_v15 = vmax.f32 %v699_v14, 0.0 }
 0x1fc   : > { %v703_v16 = vpop.f32.mrb[46].mxu1 }
 0x1fd   : > { %v704_v17 = vadd.f32 %v1910_v21, %v703_v16  ;;  %v1280_v18 = vpop.f32.mrb[47].mxu1  ;;  %1365 = vmatmul.mubr.f32.gmra.mrb[46].mxu0 %v740_v15 }
 0x1fe   : > { %1367 = vmatprep.mubr.msk.f32.mxu0 %vm1542_vm0, %v1541_v1 }
 0x1ff   : > { %v741_v5 = vmax.f32 %v704_v17, 0.0 }
 0x200   : > { %v708_v19 = vpop.f32.mrb[48].mxu1 }
 0x201   : > { %v709_v20 = vadd.f32 %v1910_v21, %v708_v19  ;;  %v1283_v22 = vpop.f32.mrb[49].mxu1  ;;  %1368 = vmatmul.mubr.f32.gmra.mrb[48].mxu0 %v741_v5 }
 0x202   : > { %1370 = vmatprep.mubr.msk.f32.mxu0 %vm1542_vm0, %v1541_v1 }
 0x203   : > { %v742_v23 = vmax.f32 %v709_v20, 0.0 }
 0x204   : > { %v713_v24 = vpop.f32.mrb[50].mxu1 }
 0x205   : > { %v714_v25 = vadd.f32 %v1910_v21, %v713_v24  ;;  %v1286_v26 = vpop.f32.mrb[51].mxu1  ;;  %1371 = vmatmul.mubr.f32.gmra.mrb[50].mxu0 %v742_v23 }
 0x206   : > { %1373 = vmatprep.mubr.msk.f32.mxu0 %vm1542_vm0, %v1541_v1 }
 0x207   : > { %v743_v27 = vmax.f32 %v714_v25, 0.0 }
 0x208   : > { %v718_v28 = vpop.f32.mrb[52].mxu1 }
 0x209   : > { %v719_v29 = vadd.f32 %v1910_v21, %v718_v28  ;;  %v1289_v30 = vpop.f32.mrb[53].mxu1  ;;  %1374 = vmatmul.mubr.f32.gmra.mrb[52].mxu0 %v743_v27 }
 0x20a   : > { %1376 = vmatprep.mubr.msk.f32.mxu0 %vm1542_vm0, %v1541_v1 }
 0x20b   : > { %v744_v31 = vmax.f32 %v719_v29, 0.0 }
 0x20c   : > { %v723_v32 = vpop.f32.mrb[54].mxu1 }
 0x20d   : > { %v724_v33 = vadd.f32 %v1910_v21, %v723_v32  ;;  %v1292_v34 = vpop.f32.mrb[55].mxu1  ;;  %1377 = vmatmul.mubr.f32.gmra.mrb[54].mxu0 %v744_v31 }
 0x20e   : > { %1379 = vmatprep.mubr.msk.f32.mxu0 %vm1542_vm0, %v1541_v1 }
 0x20f   : > { %v745_v35 = vmax.f32 %v724_v33, 0.0 }
 0x211   : > { %1380 = vmatmul.mubr.f32.gmra.mrb[56].mxu0 %v745_v35 }
 0x29c   : > { %v835_v37 = vpop.f32.mrb[20].mxu0 }
 0x29d   : > { %v836_v38 = vadd.f32 %v1973_v36, %v835_v37  ;;  %v1327_v39 = vpop.f32.mrb[21].mxu0 }
 0x29f   : > { %929 = vst [vmem:[%s1976_s29] sm:$0xff] %v836_v38 }
 0x2a0   : > { %v840_v1 = vpop.f32.mrb[22].mxu0 }
 0x2a1   : > { %v841_v21 = vadd.f32 %v1973_v36, %v840_v1  ;;  %v1330_v40 = vpop.f32.mrb[23].mxu0 }
 0x2a3   : > { %930 = vst [vmem:[%s1976_s29 + $0x8] sm:$0xff] %v841_v21 }
 0x2a4   : > { %v845_v41 = vpop.f32.mrb[24].mxu0 }
 0x2a5   : > { %v846_v42 = vadd.f32 %v1973_v36, %v845_v41  ;;  %v1333_v43 = vpop.f32.mrb[25].mxu0 }
 0x2a7   : > { %931 = vst [vmem:[%s1976_s29 + $0x10] sm:$0xff] %v846_v42 }
 0x2a8   : > { %v850_v44 = vpop.f32.mrb[26].mxu0 }
 0x2a9   : > { %v851_v45 = vadd.f32 %v1973_v36, %v850_v44  ;;  %v1336_v46 = vpop.f32.mrb[27].mxu0 }
 0x2ab   : > { %932 = vst [vmem:[%s1976_s29 + $0x18] sm:$0xff] %v851_v45 }
 0x2ac   : > { %v855_v47 = vpop.f32.mrb[28].mxu0 }
 0x2ad   : > { %v856_v48 = vadd.f32 %v1973_v36, %v855_v47  ;;  %v1339_v49 = vpop.f32.mrb[29].mxu0 }
 0x2af   : > { %933 = vst [vmem:[%s1976_s29 + $0x20] sm:$0xff] %v856_v48 }
 0x2b0   : > { %v860_v50 = vpop.f32.mrb[30].mxu0 }
 0x2b1   : > { %v861_v51 = vadd.f32 %v1973_v36, %v860_v50  ;;  %v1342_v52 = vpop.f32.mrb[31].mxu0 }
 0x2b3   : > { %934 = vst [vmem:[%s1976_s29 + $0x28] sm:$0xff] %v861_v51 }
 0x2b4   : > { %v865_v53 = vpop.f32.mrb[32].mxu0 }
 0x2b5   : > { %v866_v54 = vadd.f32 %v1973_v36, %v865_v53  ;;  %v1345_v55 = vpop.f32.mrb[33].mxu0 }
 0x2b7   : > { %935 = vst [vmem:[%s1976_s29 + $0x30] sm:$0xff] %v866_v54 }
 0x2b8   : > { %v870_v56 = vpop.f32.mrb[34].mxu0 }
 0x2b9   : > { %v871_v57 = vadd.f32 %v1973_v36, %v870_v56  ;;  %v1348_v58 = vpop.f32.mrb[35].mxu0 }
 0x2bb   : > { %936 = vst [vmem:[%s1976_s29 + $0x38] sm:$0xff] %v871_v57 }
 0x2bc   : > { %v875_v59 = vpop.f32.mrb[36].mxu0 }
 0x2bd   : > { %v876_v60 = vadd.f32 %v1973_v36, %v875_v59  ;;  %v1351_v61 = vpop.f32.mrb[37].mxu0 }
 0x2bf   : > { %937 = vst [vmem:[%s1976_s29 + $0x40] sm:$0xff] %v876_v60 }
 0x2c0   : > { %v880_v62 = vpop.f32.mrb[38].mxu0 }
 0x2c1   : > { %v881_v63 = vadd.f32 %v1973_v36, %v880_v62  ;;  %v1354_v0 = vpop.f32.mrb[39].mxu0 }
 0x2c3   : > { %938 = vst [vmem:[%s1976_s29 + $0x48] sm:$0xff] %v881_v63 }
 0x2c4   : > { %v885_v3 = vpop.f32.mrb[40].mxu0 }
 0x2c5   : > { %v886_v4 = vadd.f32 %v1973_v36, %v885_v3  ;;  %v1357_v6 = vpop.f32.mrb[41].mxu0 }
 0x2c7   : > { %939 = vst [vmem:[%s1976_s29 + $0x50] sm:$0xff] %v886_v4 }
 0x2c8   : > { %v890_v7 = vpop.f32.mrb[42].mxu0 }
 0x2c9   : > { %v891_v8 = vadd.f32 %v1973_v36, %v890_v7  ;;  %v1360_v9 = vpop.f32.mrb[43].mxu0 }
 0x2cb   : > { %940 = vst [vmem:[%s1976_s29 + $0x58] sm:$0xff] %v891_v8 }
 0x2cc   : > { %v895_v10 = vpop.f32.mrb[44].mxu0 }
 0x2cd   : > { %v896_v11 = vadd.f32 %v1973_v36, %v895_v10  ;;  %v1363_v12 = vpop.f32.mrb[45].mxu0 }
 0x2cf   : > { %941 = vst [vmem:[%s1976_s29 + $0x60] sm:$0xff] %v896_v11 }
 0x2d0   : > { %v900_v13 = vpop.f32.mrb[46].mxu0 }
 0x2d1   : > { %v901_v14 = vadd.f32 %v1973_v36, %v900_v13  ;;  %v1366_v2 = vpop.f32.mrb[47].mxu0 }
 0x2d3   : > { %942 = vst [vmem:[%s1976_s29 + $0x68] sm:$0xff] %v901_v14 }
 0x2d4   : > { %v905_v15 = vpop.f32.mrb[48].mxu0 }
 0x2d5   : > { %v906_v16 = vadd.f32 %v1973_v36, %v905_v15  ;;  %v1369_v17 = vpop.f32.mrb[49].mxu0 }
 0x2d7   : > { %943 = vst [vmem:[%s1976_s29 + $0x70] sm:$0xff] %v906_v16 }
 0x2d8   : > { %v910_v18 = vpop.f32.mrb[50].mxu0 }
 0x2d9   : > { %v911_v5 = vadd.f32 %v1973_v36, %v910_v18  ;;  %v1372_v19 = vpop.f32.mrb[51].mxu0 }
 0x2db   : > { %944 = vst [vmem:[%s1976_s29 + $0x78] sm:$0xff] %v911_v5 }
 0x2dc   : > { %v915_v20 = vpop.f32.mrb[52].mxu0 }
 0x2dd   : > { %v916_v22 = vadd.f32 %v1973_v36, %v915_v20  ;;  %v1375_v23 = vpop.f32.mrb[53].mxu0 }
 0x2df   : > { %945 = vst [vmem:[%s1976_s29 + $0x80] sm:$0xff] %v916_v22 }
 0x2e0   : > { %v920_v24 = vpop.f32.mrb[54].mxu0 }
 0x2e1   : > { %v921_v25 = vadd.f32 %v1973_v36, %v920_v24  ;;  %v1378_v26 = vpop.f32.mrb[55].mxu0 }
 0x2e3   : > { %946 = vst [vmem:[%s1976_s29 + $0x88] sm:$0xff] %v921_v25 }
 0x2e4   : > { %v925_v27 = vpop.f32.mrb[56].mxu0 }
 0x2e5   : > { %v926_v28 = vadd.f32 %v1973_v36, %v925_v27  ;;  %v1381_v29 = vpop.f32.mrb[57].mxu0 }
 0x2e7   : > { %947 = vst [vmem:[%s1976_s29 + $0x90] sm:$0xff] %v926_v28 }
 0x2e8   : > { %1490 = shalt.err (!%p1487_p3)
}
 0x2e9   : > { %s1491_s20 = scalar_lea.hbm %s2018_s14, 2432  ;;  %s1495_s23 = scalar_lea.hbm %s2074_s7, 4864 }
 0x2ea   : > { %p1492_p4 = scmp.ne.s32.totalorder %s2018_s14, %s1491_s20  ;;  %p1496_p9 = scmp.lt.u32.totalorder %s2018_s14, %s2074_s7 }
 0x2eb   : > { %p1497_p10 = scmp.lt.u32.totalorder %s1495_s23, %s1491_s20  ;;  %p1499_p12 = scmp.lt.u32.totalorder %s1491_s20, %s2018_s14 }
 0x2ec   : > { %p1493_p7 = pnand %p1492_p4, %p1625_p5 }
 0x2ed   : > { %p1498_p11 = por %p1497_p10, %p1496_p9 }
 0x2ee   : > { %p1494_p8 = pneg %p1493_p7 }
 0x2ef   : > { %p1500_p13 = por %p1499_p12, %p1498_p11 }
 0x2f1   : > { %p1501_p0 = pnand %p1500_p13, %p1494_p8 }
 0x2f3   : > { %1504 = shalt.err (!%p1501_p0)
}
 0x2f4   : > { %s1545_s9 = smov 128   ;;  %s1546_s13 = smov 8  }
 0x2f5   : > { %1433 = dma.vmem_to_hbm [thread:$0]  (%p1625_p5), %s2020_s19, 2432, %s2018_s14, %s2026_s28, %s1545_s9, %s1545_s9, %s1546_s13  }
 0x2f6 PF: > { %p1439_p1 = scmp.ge.s32.totalorder %s1539_s27, 2  ;;  %s977_s15 = sand.u32 1, %s1527_s24  }
 0x2f7   : > { %s978_s16 = scalar_lea.sflag [#allocation3], %s977_s15 }
 0x2f8   : > { %p1436_p2 = pnand %p1439_p1, %p1629_p6 }
 0x2fa   : > { %1522 = dma.done.wait (!%p1436_p2), %s978_s16, 2432  }
 0x2fb   : > { %1524 = vsyncadd (!%p1436_p2), %s978_s16, 4294964864  ;;  %p17_p3 = scmp.ge.s32.totalorder %s1612_s30, 4   ;;  %s2077_s24 = smov %s1531_s25 }
 0x2fc   : > { %s2078_s25 = smov %s1535_s26  ;;  %s2079_s26 = smov %s1623_s10 }
 0x2fd   : > { %s2080_s27 = smov %s1612_s30  ;;  %19 = sbr.rel (!%p17_p3) target bundleno = 3 (0x3), region = 83 }
 0x304   :  { %983 = vsyncpa [#allocation3], 1 }
 0x305   :  { %985 = vsyncpa [#allocation3 + $0x1], 1 }

</bundles_post_ra>
